<compile_context>
chip_gen: v7x
topology: tpu7x:2x2x1
jax: 0.10.0
libtpu: 0.0.40
codegen_flags: <defaults>
</compile_context>

<pallas_src>
import functools

import jax
import jax.numpy as jnp
from jax.experimental import pallas as pl
from jax.experimental.pallas import tpu as pltpu


def _cdiv(a, b):
    return -(-a // b)


@functools.lru_cache(maxsize=1)
def _tpu_budget():
    """Best-effort (vmem_bytes_per_core, num_tensorcores) with conservative fallbacks."""
    vmem = None
    cores = None
    try:
        info = pltpu.get_tpu_info()
        v = getattr(info, "vmem_capacity_bytes", None)
        if v:
            vmem = int(v)
        for name in ("tensorcores_per_chip", "num_tensorcores", "num_cores",
                     "core_count"):
            c = getattr(info, name, None)
            if c:
                cores = int(c)
                break
    except Exception:
        pass
    kind = ""
    try:
        kind = jax.devices()[0].device_kind.lower()
    except Exception:
        pass
    single_tc_part = ("v5" in kind) or ("v6" in kind)
    v7_part = ("v7" in kind) or ("7x" in kind)
    if vmem is None:
        vmem = (128 << 20) if single_tc_part else (64 << 20)
    if v7_part:                      # per-TensorCore VMEM on v7x is 64 MiB
        vmem = min(vmem, 64 << 20)
    if cores is None:
        cores = 1 if single_tc_part else 2
    return vmem, cores


def _make_dice_kernel(activation, threshold, has_weight, block_is_3d,
                      n_blocks, data_ragged, has_overhang, last_valid):
    """Kernel body for (B, rows, 128) blocks (block_is_3d) or (rows, 128) blocks."""

    def _accumulate(x_ref, t_ref, w_ref, oi_ref, oa_ref, masked):
        x = x_ref[...].astype(jnp.float32)
        t = t_ref[...].astype(jnp.float32)

        if activation == "sigmoid":
            # Exact 1/(1+e): exp() runs on the EUP. pl.reciprocal(..., approx=True)
            # is a further opt-in option when ~1e-3 metric error is acceptable.
            x = 1.0 / (1.0 + jnp.exp(-x))

        if has_weight:
            w = w_ref[...].astype(jnp.float32)   # broadcasts over batch dim (3-D path)
            x = x * w
            t = t * w

        if threshold is not None:
            x = (x >= jnp.float32(threshold)).astype(jnp.float32)

        inter = x * t
        add = x + t

        if masked:
            # Only the last in-range block is ragged; mask after all transforms so
            # activation/weight/threshold on undefined tail elements cannot leak in.
            if block_is_3d:
                row_idx = jax.lax.broadcasted_iota(jnp.int32, inter.shape, 1)
                valid = row_idx < last_valid                 # valid 128-chunk rows
            else:
                r = jax.lax.broadcasted_iota(jnp.int32, inter.shape, 0)
                l = jax.lax.broadcasted_iota(jnp.int32, inter.shape, 1)
                valid = (r * 128 + l) < last_valid           # valid flat elements
            inter = jnp.where(valid, inter, 0.0)
            add = jnp.where(valid, add, 0.0)

        # Reduce the block to one lane-partial (cross-sublane reduce -> XLU) and
        # accumulate into the tiny revisited output tile: no full-block RMW traffic.
        inter2 = inter.reshape(-1, 128)
        add2 = add.reshape(-1, 128)
        oi_ref[...] += jnp.sum(inter2, axis=0).reshape(oi_ref.shape)
        oa_ref[...] += jnp.sum(add2, axis=0).reshape(oa_ref.shape)

    def kernel(*refs):
        if has_weight:
            x_ref, t_ref, w_ref, oi_ref, oa_ref = refs
        else:
            x_ref, t_ref, oi_ref, oa_ref = refs
            w_ref = None

        i = pl.program_id(1)
        g = pl.program_id(0) * pl.num_programs(1) + i        # global block index

        @pl.when(i == 0)
        def _init():
            oi_ref[...] = jnp.zeros_like(oi_ref)
            oa_ref[...] = jnp.zeros_like(oa_ref)

        if data_ragged:
            @pl.when(g < n_blocks - 1)
            def _full():
                _accumulate(x_ref, t_ref, w_ref, oi_ref, oa_ref, masked=False)

            @pl.when(g == n_blocks - 1)
            def _tail():
                _accumulate(x_ref, t_ref, w_ref, oi_ref, oa_ref, masked=True)
            # g > n_blocks - 1 (ceil-split overhang): contributes nothing.
        elif has_overhang:
            @pl.when(g < n_blocks)
            def _in_range():
                _accumulate(x_ref, t_ref, w_ref, oi_ref, oa_ref, masked=False)
        else:
            _accumulate(x_ref, t_ref, w_ref, oi_ref, oa_ref, masked=False)

    return kernel


@functools.partial(jax.jit,
                   static_argnames=("activation", "threshold", "block_rows", "splits"))
def dice_coeff(inputs, target, pos_weight=None, *, activation=None, threshold=None,
               block_rows=None, splits=None):
    """Dice coefficient matching DiceCoeff.forward. Returns an f32 scalar."""
    b = inputs.shape[0]
    x2 = inputs.reshape(b, -1)          # free, row-major: == input.view(B, -1)
    t2 = target.reshape(b, -1)
    n = x2.shape[1]
    has_weight = pos_weight is not None

    vmem_bytes, num_cores = _tpu_budget()
    # Block sizing in f32-compute terms (~6 MiB/input on 128 MiB parts, ~3 MiB on
    # v7x) so streams + elementwise temporaries stay comfortably inside VMEM.
    target_bytes = min(max(vmem_bytes // 20, 1 << 20), 6 << 20)
    vmem_limit = max(32 << 20, min((vmem_bytes * 3) // 4, 96 << 20))

    if n % 128 == 0:
        # Main path: view features as (n_chunks, 128) so (B, rows, 128) blocks keep
        # every (8,128) vreg tile dense for any batch size; weight broadcasts over B.
        n_chunks = n // 128
        xk = x2.reshape(b, n_chunks, 128)
        tk = t2.reshape(b, n_chunks, 128)
        wk = pos_weight.reshape(n_chunks, 128) if has_weight else None
        row_bytes = b * 128 * 4
        rows = int(block_rows) if block_rows is not None else max(8, target_bytes // row_bytes)
        if rows >= n_chunks:
            rows = n_chunks                       # full axis (legal even if not %8)
        else:
            rows = max(8, (rows // 8) * 8)
        n_blocks = _cdiv(n_chunks, rows)
        data_ragged = (n_chunks % rows) != 0
        last_valid = n_chunks - (n_blocks - 1) * rows     # valid chunk-rows, last blk
        block_is_3d = True
        data_block = (b, rows, 128)
        w_block = (rows, 128)
    else:
        # Fallback (n % 128 != 0): flatten the whole B*N element stream to (M, 128)
        # chunk-rows -> dense (8,128) tiles for any batch size; only the final block
        # is lane-masked (mask applied after all transforms).
        # TODO(synk): the zero-pad (and B-fold weight tile) is one extra XLA pass
        # over the inputs; avoidable with a manual-DMA ragged tail if it matters.
        e = b * n
        m0 = _cdiv(e, 128)
        row_bytes = 128 * 4
        rows = int(block_rows) if block_rows is not None else max(8, target_bytes // row_bytes)
        rows = max(8, (rows // 8) * 8)
        if rows >= m0:
            rows = _cdiv(m0, 8) * 8
        m_pad = _cdiv(m0, rows) * rows
        pad = m_pad * 128 - e
        xk = jnp.pad(x2.reshape(-1), (0, pad)).reshape(m_pad, 128)
        tk = jnp.pad(t2.reshape(-1), (0, pad)).reshape(m_pad, 128)
        wk = None
        if has_weight:
            wflat = jnp.tile(pos_weight.reshape(-1), (b,))
            wk = jnp.pad(wflat, (0, pad)).reshape(m_pad, 128)
        n_blocks = m_pad // rows
        data_ragged = (e % (rows * 128)) != 0
        last_valid = e - (n_blocks - 1) * rows * 128      # valid elements, last block
        block_is_3d = False
        data_block = (rows, 128)
        w_block = (rows, 128)

    # Leading "parallel" axis lets v7x's two TensorCores split the reduction.  Odd
    # block counts use a ceil-split; the overhanging block is clamped in the
    # index_map and skipped in-kernel, so no reliance on out-of-range block reads.
    # TODO(synk): confirm the 2-TC sharding engages on v7x; if not, switch this
    # axis to pltpu.CORE_PARALLEL.
    if splits is not None:
        num_splits = int(splits)
    else:
        num_splits = 2 if num_cores >= 2 else 1
    num_splits = max(1, min(num_splits, n_blocks))
    steps_per_split = _cdiv(n_blocks, num_splits)
    has_overhang = num_splits * steps_per_split > n_blocks
    last_blk = n_blocks - 1

    def _gidx(s, i):
        g = s * steps_per_split + i
        return jnp.minimum(g, last_blk) if has_overhang else g

    if block_is_3d:
        data_imap = lambda s, i: (0, _gidx(s, i), 0)
    else:
        data_imap = lambda s, i: (_gidx(s, i), 0)
    w_imap = lambda s, i: (_gidx(s, i), 0)

    in_specs = [pl.BlockSpec(data_block, data_imap),
                pl.BlockSpec(data_block, data_imap)]
    operands = [xk, tk]
    if has_weight:
        in_specs.append(pl.BlockSpec(w_block, w_imap))
        operands.append(wk)

    kernel = _make_dice_kernel(activation, threshold, has_weight, block_is_3d,
                               n_blocks, data_ragged, has_overhang, last_valid)

    out_i, out_a = pl.pallas_call(
        kernel,
        out_shape=(jax.ShapeDtypeStruct((num_splits, 1, 128), jnp.float32),
                   jax.ShapeDtypeStruct((num_splits, 1, 128), jnp.float32)),
        grid_spec=pltpu.PrefetchScalarGridSpec(
            num_scalar_prefetch=0,
            grid=(num_splits, steps_per_split),
            in_specs=in_specs,
            out_specs=[pl.BlockSpec((1, 1, 128), lambda s, i: (s, 0, 0)),
                       pl.BlockSpec((1, 1, 128), lambda s, i: (s, 0, 0))],
        ),
        compiler_params=pltpu.CompilerParams(
            dimension_semantics=("parallel", "arbitrary"),
            vmem_limit_bytes=int(vmem_limit),
        ),
    )(*operands)

    smooth = jnp.float32(1.0)
    intersection = jnp.sum(out_i)      # tiny (num_splits x 128) XLA reduce
    addition = jnp.sum(out_a)
    return (2.0 * intersection + smooth) / (addition + smooth)


def _dice_ref(inputs, target, pos_weight=None, activation=None, threshold=None):
    """Pure-JAX reference mirroring the PyTorch module."""
    smooth = 1.0
    x = inputs.astype(jnp.float32)
    t = target.astype(jnp.float32)
    if activation == "sigmoid":
        x = jax.nn.sigmoid(x)
    b = x.shape[0]
    iflat = x.reshape(b, -1)
    tflat = t.reshape(b, -1)
    if pos_weight is not None:
        w = pos_weight.reshape(1, -1).astype(jnp.float32)
        iflat = iflat * w
        tflat = tflat * w
    if threshold is not None:
        iflat = (iflat >= threshold).astype(jnp.float32)
    intersection = jnp.sum(iflat * tflat)
    addition = jnp.sum(iflat + tflat)
    return (2.0 * intersection + smooth) / (addition + smooth)


if __name__ == "__main__":
    key = jax.random.PRNGKey(0)
    k1, k2, k3, k4, k5, k6 = jax.random.split(key, 6)

    B, C, H, W = 2, 4, 16, 16
    # prediction mask in [0, 1], binary ground-truth mask (NCHW like PyTorch)
    x = jax.random.uniform(k1, (B, C, H, W), dtype=jnp.float32)
    t = (jax.random.uniform(k2, (B, C, H, W), dtype=jnp.float32) > 0.5).astype(jnp.float32)
    pw = 0.5 + jax.random.uniform(k3, (C * H * W,), dtype=jnp.float32)

    # 1) default config
    out0 = dice_coeff(x, t)
    # 2) weighted + sigmoid activation on logits
    xl = jax.random.normal(k4, (B, C, H, W), dtype=jnp.float32)
    out1 = dice_coeff(xl, t, pw, activation="sigmoid")
    # 3) weighted + threshold
    out2 = dice_coeff(x, t, pw, threshold=0.75)
    # 4) multi-block + ragged last block + forced 2-way split with an overhang
    #    block (N=32768 -> 256 chunks, rows=24 -> 11 blocks, ceil-split -> 12)
    xb = jax.random.uniform(k5, (2, 8, 64, 64), dtype=jnp.float32)
    tb = (jax.random.uniform(k6, (2, 8, 64, 64), dtype=jnp.float32) > 0.5).astype(jnp.float32)
    out3 = dice_coeff(xb, tb, block_rows=24, splits=2)
    # 5) fallback path: feature count not a multiple of 128, flattened + lane-masked,
    #    with weight + threshold and a forced 2-way split
    xf = jax.random.uniform(k1, (2, 3, 33, 33), dtype=jnp.float32)
    tf_ = (jax.random.uniform(k2, (2, 3, 33, 33), dtype=jnp.float32) > 0.5).astype(jnp.float32)
    pwf = 0.5 + jax.random.uniform(k3, (3 * 33 * 33,), dtype=jnp.float32)
    out4 = dice_coeff(xf, tf_, pwf, threshold=0.6, block_rows=16, splits=2)

    jax.block_until_ready((out0, out1, out2, out3, out4))

    r0 = _dice_ref(x, t)
    r1 = _dice_ref(xl, t, pw, activation="sigmoid")
    r2 = _dice_ref(x, t, pw, threshold=0.75)
    r3 = _dice_ref(xb, tb)
    r4 = _dice_ref(xf, tf_, pwf, threshold=0.6)

    assert jnp.allclose(out0, r0, rtol=1e-5, atol=1e-5), (out0, r0)
    assert jnp.allclose(out1, r1, rtol=1e-4, atol=1e-5), (out1, r1)
    assert jnp.allclose(out2, r2, rtol=1e-5, atol=1e-5), (out2, r2)
    assert jnp.allclose(out3, r3, rtol=1e-5, atol=1e-5), (out3, r3)
    assert jnp.allclose(out4, r4, rtol=1e-5, atol=1e-5), (out4, r4)

    print("KERNEL_OK")
</pallas_src>

<mosaic_0001>
module attributes {stable_mosaic.version = 11 : i64} {
  func.func @kernel(%arg0: i32, %arg1: i32, %arg2: memref<2x8x128xf32, #tpu.memory_space<vmem>>, %arg3: memref<2x8x128xf32, #tpu.memory_space<vmem>>, %arg4: memref<1x1x128xf32, #tpu.memory_space<vmem>>, %arg5: memref<1x1x128xf32, #tpu.memory_space<vmem>>) attributes {dimension_semantics = [#tpu.dimension_semantics<parallel>, #tpu.dimension_semantics<arbitrary>], iteration_bounds = array<i64: 1, 1>, scalar_prefetch = 0 : i64, scratch_operands = 0 : i64, tpu.core_type = #tpu.core_type<tc>, window_params = [{transform_indices = @transform_0, window_bounds = array<i64: 2, 8, 128>}, {transform_indices = @transform_1, window_bounds = array<i64: 2, 8, 128>}, {transform_indices = @transform_2, window_bounds = array<i64: 1, 1, 128>}, {transform_indices = @transform_3, window_bounds = array<i64: 1, 1, 128>}]} {
    %c0_i32 = arith.constant 0 : i32
    %0 = arith.cmpi eq, %arg1, %c0_i32 : i32
    %1 = arith.extui %0 : i1 to i32
    %c0_i32_0 = arith.constant 0 : i32
    %2 = arith.cmpi ne, %1, %c0_i32_0 : i32
    scf.if %2 {
      %cst_19 = arith.constant 0.000000e+00 : f32
      %19 = vector.broadcast %cst_19 : f32 to vector<1x1x128xf32>
      %c0_20 = arith.constant 0 : index
      %c0_21 = arith.constant 0 : index
      %c0_22 = arith.constant 0 : index
      %20 = vector.load %arg4[%c0_20, %c0_21, %c0_22] : memref<1x1x128xf32, #tpu.memory_space<vmem>>, vector<1x1x128xf32>
      tpu.vector_store %arg4[%c0_20, %c0_21, %c0_22], %19 {strides = array<i32>} : memref<1x1x128xf32, #tpu.memory_space<vmem>>, vector<1x1x128xf32>,
      %cst_23 = arith.constant 0.000000e+00 : f32
      %21 = vector.broadcast %cst_23 : f32 to vector<1x1x128xf32>
      %c0_24 = arith.constant 0 : index
      %c0_25 = arith.constant 0 : index
      %c0_26 = arith.constant 0 : index
      %22 = vector.load %arg5[%c0_24, %c0_25, %c0_26] : memref<1x1x128xf32, #tpu.memory_space<vmem>>, vector<1x1x128xf32>
      tpu.vector_store %arg5[%c0_24, %c0_25, %c0_26], %21 {strides = array<i32>} : memref<1x1x128xf32, #tpu.memory_space<vmem>>, vector<1x1x128xf32>,
    } else {
    }
    %c0 = arith.constant 0 : index
    %c0_1 = arith.constant 0 : index
    %c0_2 = arith.constant 0 : index
    %3 = vector.load %arg2[%c0, %c0_1, %c0_2] : memref<2x8x128xf32, #tpu.memory_space<vmem>>, vector<2x8x128xf32>
    %c0_3 = arith.constant 0 : index
    %c0_4 = arith.constant 0 : index
    %c0_5 = arith.constant 0 : index
    %4 = vector.load %arg3[%c0_3, %c0_4, %c0_5] : memref<2x8x128xf32, #tpu.memory_space<vmem>>, vector<2x8x128xf32>
    %5 = arith.mulf %3, %4 : vector<2x8x128xf32>
    %6 = arith.addf %3, %4 : vector<2x8x128xf32>
    %7 = vector.shape_cast %5 : vector<2x8x128xf32> to vector<16x128xf32>
    %8 = vector.shape_cast %6 : vector<2x8x128xf32> to vector<16x128xf32>
    %c0_6 = arith.constant 0 : index
    %c0_7 = arith.constant 0 : index
    %c0_8 = arith.constant 0 : index
    %9 = vector.load %arg4[%c0_6, %c0_7, %c0_8] : memref<1x1x128xf32, #tpu.memory_space<vmem>>, vector<1x1x128xf32>
    %cst = arith.constant dense<0.000000e+00> : vector<128xf32>
    %10 = vector.multi_reduction <add>, %7, %cst [0] : vector<16x128xf32> to vector<128xf32>
    %11 = vector.shape_cast %10 : vector<128xf32> to vector<1x1x128xf32>
    %12 = arith.addf %9, %11 : vector<1x1x128xf32>
    %c0_9 = arith.constant 0 : index
    %c0_10 = arith.constant 0 : index
    %c0_11 = arith.constant 0 : index
    %13 = vector.load %arg4[%c0_9, %c0_10, %c0_11] : memref<1x1x128xf32, #tpu.memory_space<vmem>>, vector<1x1x128xf32>
    tpu.vector_store %arg4[%c0_9, %c0_10, %c0_11], %12 {strides = array<i32>} : memref<1x1x128xf32, #tpu.memory_space<vmem>>, vector<1x1x128xf32>,
    %c0_12 = arith.constant 0 : index
    %c0_13 = arith.constant 0 : index
    %c0_14 = arith.constant 0 : index
    %14 = vector.load %arg5[%c0_12, %c0_13, %c0_14] : memref<1x1x128xf32, #tpu.memory_space<vmem>>, vector<1x1x128xf32>
    %cst_15 = arith.constant dense<0.000000e+00> : vector<128xf32>
    %15 = vector.multi_reduction <add>, %8, %cst_15 [0] : vector<16x128xf32> to vector<128xf32>
    %16 = vector.shape_cast %15 : vector<128xf32> to vector<1x1x128xf32>
    %17 = arith.addf %14, %16 : vector<1x1x128xf32>
    %c0_16 = arith.constant 0 : index
    %c0_17 = arith.constant 0 : index
    %c0_18 = arith.constant 0 : index
    %18 = vector.load %arg5[%c0_16, %c0_17, %c0_18] : memref<1x1x128xf32, #tpu.memory_space<vmem>>, vector<1x1x128xf32>
    tpu.vector_store %arg5[%c0_16, %c0_17, %c0_18], %17 {strides = array<i32>} : memref<1x1x128xf32, #tpu.memory_space<vmem>>, vector<1x1x128xf32>,
    return
  }
  func.func @transform_0(%arg0: i32, %arg1: i32) -> (i32, i32, i32) {
    %c1_i32 = arith.constant 1 : i32
    %0 = arith.muli %arg0, %c1_i32 : i32
    %1 = arith.addi %0, %arg1 : i32
    %c0_i32 = arith.constant 0 : i32
    %c0_i32_0 = arith.constant 0 : i32
    %c0_i32_1 = arith.constant 0 : i32
    return %c0_i32, %1, %c0_i32_0 : i32, i32, i32
  }
  func.func @transform_1(%arg0: i32, %arg1: i32) -> (i32, i32, i32) {
    %c1_i32 = arith.constant 1 : i32
    %0 = arith.muli %arg0, %c1_i32 : i32
    %1 = arith.addi %0, %arg1 : i32
    %c0_i32 = arith.constant 0 : i32
    %c0_i32_0 = arith.constant 0 : i32
    %c0_i32_1 = arith.constant 0 : i32
    return %c0_i32, %1, %c0_i32_0 : i32, i32, i32
  }
  func.func @transform_2(%arg0: i32, %arg1: i32) -> (i32, i32, i32) {
    %c0_i32 = arith.constant 0 : i32
    %c0_i32_0 = arith.constant 0 : i32
    %c0_i32_1 = arith.constant 0 : i32
    return %arg0, %c0_i32, %c0_i32_0 : i32, i32, i32
  }
  func.func @transform_3(%arg0: i32, %arg1: i32) -> (i32, i32, i32) {
    %c0_i32 = arith.constant 0 : i32
    %c0_i32_0 = arith.constant 0 : i32
    %c0_i32_1 = arith.constant 0 : i32
    return %arg0, %c0_i32, %c0_i32_0 : i32, i32, i32
  }
}

</mosaic_0001>

<bundles_post_ra>
// kernel: dice_coeff.1
= control target key start
LH: loop header
LB: loop body
LE: loop exit
PB: predicated region body
PF: predicated region fallthrough
CT: control target
= control target key end

     0   :  { %v102_v0 = vmov 0.0   ;;  %s153_s2 = inlined_call_operand.vmem [shape: f32[1,1,128], index: 2, kind: output, shape index: {0}]   ;;  %s154_s3 = inlined_call_operand.vmem [shape: f32[1,1,128], index: 3, kind: output, shape index: {1}]   ;;  %s155_s0 = inlined_call_operand.vmem [shape: f32[2,8,128], index: 0, kind: input, shape index: {}]   ;;  %s156_s1 = inlined_call_operand.vmem [shape: f32[2,8,128], index: 1, kind: input, shape index: {}]  }
   0x1   :  { %51 = vst [vmem:[%s153_s2] sm:$0x1] %v102_v0  ;;  %52 = vst [vmem:[%s154_s3] sm:$0x1] %v102_v0  ;;  %v53_v1 = vld [vmem:[%s155_s0] sm:$0xff]  ;;  %v54_v2 = vld [vmem:[%s155_s0 + $0x8] sm:$0xff] }
   0x2   :  { %v55_v3 = vld [vmem:[%s156_s1] sm:$0xff]  ;;  %v56_v4 = vld [vmem:[%s156_s1 + $0x8] sm:$0xff] }
   0x3   :  { %v57_v5 = vmul.f32 %v55_v3, %v53_v1  ;;  %v59_v6 = vadd.f32 %v55_v3, %v53_v1  ;;  %v58_v7 = vmul.f32 %v56_v4, %v54_v2  ;;  %v60_v8 = vadd.f32 %v56_v4, %v54_v2 }
   0x5   :  { %v62_v9 = vadd.f32 %v58_v7, %v57_v5  ;;  %v72_v10 = vadd.f32 %v60_v8, %v59_v6 }
   0x7   :  { %v63_v11 = vrot.slane %v62_v9, 4  ;;  %v73_v12 = vrot.slane %v72_v10, 4 }
   0x8   :  { %v61_v21 = vld [vmem:[%s153_s2] sm:$0x1] }
   0x9   :  { %v64_v13 = vadd.f32 %v63_v11, %v62_v9  ;;  %v74_v14 = vadd.f32 %v73_v12, %v72_v10  ;;  %v71_v22 = vld [vmem:[%s154_s3] sm:$0x1] }
   0xb   :  { %v65_v15 = vrot.slane %v64_v13, 2  ;;  %v75_v16 = vrot.slane %v74_v14, 2 }
   0xd   :  { %v66_v17 = vadd.f32 %v65_v15, %v64_v13  ;;  %v76_v18 = vadd.f32 %v75_v16, %v74_v14 }
   0xf   :  { %v67_v19 = vrot.slane %v66_v17, 1  ;;  %v77_v20 = vrot.slane %v76_v18, 1 }
  0x11   :  { %v68_v23 = vadd.f32 %v67_v19, %v66_v17  ;;  %v78_v24 = vadd.f32 %v77_v20, %v76_v18 }
  0x13   :  { %v69_v25 = vadd.f32 %v68_v23, %v61_v21  ;;  %v79_v26 = vadd.f32 %v78_v24, %v71_v22 }
  0x15   :  { %70 = vst [vmem:[%s153_s2] sm:$0x1] %v69_v25  ;;  %80 = vst [vmem:[%s154_s3] sm:$0x1] %v79_v26 }

</bundles_post_ra>
